<compile_context>
chip_gen: v5e
topology: v5e:2x2
jax: 0.10.0
libtpu: 0.0.40
codegen_flags: <defaults>
</compile_context>

<pallas_src>
import functools

import jax
import jax.numpy as jnp
import numpy as np
from jax.experimental import pallas as pl
from jax.experimental.pallas import tpu as pltpu


def _round_up(x, m):
    return (x + m - 1) // m * m


def lstm_kernel(xw_ref, whh_ref, wlin_ref, blin_ref, out_ref, h_ref, c_ref):
    # xw_ref  : (t_chunk, B_pad, 4*H_pad) f32  precomputed x@W_ih^T + bias, time-major
    # whh_ref : (H_pad, 4*H_pad)          bf16 hidden->hidden weights (transposed, gate-padded)
    # wlin_ref: (H_pad, OUT_pad)          f32  final linear weights (transposed, padded)
    # blin_ref: (1, OUT_pad)              f32  final linear bias (padded)
    # out_ref : (B_pad, OUT_pad)          f32
    # h_ref/c_ref : (B_pad, H_pad) f32 VMEM scratch, persistent across grid steps
    t_chunk = xw_ref.shape[0]
    hp = whh_ref.shape[0]

    @pl.when(pl.program_id(0) == 0)
    def _():
        h_ref[...] = jnp.zeros_like(h_ref)
        c_ref[...] = jnp.zeros_like(c_ref)

    whh = whh_ref[...]  # hoisted out of the time loop (bf16 MXU operand)

    def step(t, carry):
        h, c = carry
        # Only the h->h matmul remains on the sequential critical path; the
        # input projection (incl. bias) was precomputed and is DMA-prefetched.
        gates = xw_ref[t] + jnp.dot(
            h.astype(jnp.bfloat16), whh, preferred_element_type=jnp.float32
        )  # (B_pad, 4*H_pad) f32
        # Gate blocks are padded to full 128-lane tiles -> lane-aligned slices,
        # no cross-lane shuffles. Padded lanes stay exactly zero.
        i_g = jax.nn.sigmoid(gates[:, 0 * hp:1 * hp])
        f_g = jax.nn.sigmoid(gates[:, 1 * hp:2 * hp])
        g_g = jnp.tanh(gates[:, 2 * hp:3 * hp])
        o_g = jax.nn.sigmoid(gates[:, 3 * hp:4 * hp])
        c_new = f_g * c + i_g * g_g
        h_new = o_g * jnp.tanh(c_new)
        return h_new, c_new

    # T is static and small per chunk -> fully unroll for scheduler visibility.
    h, c = jax.lax.fori_loop(
        0, t_chunk, step, (h_ref[...], c_ref[...]), unroll=True
    )
    h_ref[...] = h
    c_ref[...] = c

    # Final Linear head. The output block is resident across the grid; the
    # last grid step's writeback is the answer (earlier writes are cheap).
    out_ref[...] = (
        jnp.dot(h, wlin_ref[...], preferred_element_type=jnp.float32)
        + blin_ref[...]
    )


@functools.partial(jax.jit, static_argnames=("time_chunk",))
def lstm_forward(x, w_ih, w_hh, b_ih, b_hh, w_lin, b_lin, *, time_chunk=4):
    """x: (B, T, D_in) batch-first, like the PyTorch module. Returns (B, out_dim)."""
    B, T, D_in = x.shape
    H = w_hh.shape[1]
    out_dim = w_lin.shape[0]

    H_pad = _round_up(H, 128)       # each gate gets a full 128-lane block
    B_pad = _round_up(B, 8)         # sublane alignment
    OUT_pad = _round_up(out_dim, 128)  # unmasked output store

    # Largest chunk of timesteps per grid step that divides T (static).
    tc = min(time_chunk, T)
    while T % tc:
        tc -= 1

    f32 = jnp.float32

    # --- glue: pre-transpose, gate-pad and cast weights ----------------------
    wih_p = (
        jnp.zeros((D_in, 4, H_pad), f32)
        .at[:, :, :H].set(jnp.transpose(w_ih).astype(f32).reshape(D_in, 4, H))
        .reshape(D_in, 4 * H_pad)
    )
    b_p = (
        jnp.zeros((4, H_pad), f32)
        .at[:, :H].set((b_ih + b_hh).astype(f32).reshape(4, H))
        .reshape(4 * H_pad)
    )
    whh_p = (
        jnp.zeros((H_pad, 4, H_pad), f32)
        .at[:H, :, :H].set(jnp.transpose(w_hh).astype(f32).reshape(H, 4, H))
        .reshape(H_pad, 4 * H_pad)
        .astype(jnp.bfloat16)       # MXU operand in bf16, f32 accumulation
    )
    wlin_p = (
        jnp.zeros((H_pad, OUT_pad), f32)
        .at[:H, :out_dim].set(jnp.transpose(w_lin).astype(f32))
    )
    blin_p = jnp.zeros((1, OUT_pad), f32).at[0, :out_dim].set(b_lin.astype(f32))

    # --- hoist the input projection out of the recurrence --------------------
    # einsum fuses the batch->time transpose into one big matmul off the
    # critical path; the combined bias is folded in here once.
    x_p = jnp.zeros((B_pad, T, D_in), f32).at[:B].set(x.astype(f32))
    xw = jnp.einsum(
        "btd,dg->tbg", x_p, wih_p, preferred_element_type=jnp.float32
    ) + b_p[None, None, :]          # (T, B_pad, 4*H_pad)

    grid = (T // tc,)
    out_p = pl.pallas_call(
        lstm_kernel,
        out_shape=jax.ShapeDtypeStruct((B_pad, OUT_pad), f32),
        grid_spec=pltpu.PrefetchScalarGridSpec(
            num_scalar_prefetch=0,
            grid=grid,
            in_specs=[
                # per-chunk slab of the precomputed projection (pipelined DMA)
                pl.BlockSpec((tc, B_pad, 4 * H_pad), lambda t: (t, 0, 0)),
                # weights stay resident in VMEM across the whole grid
                pl.BlockSpec((H_pad, 4 * H_pad), lambda t: (0, 0)),
                pl.BlockSpec((H_pad, OUT_pad), lambda t: (0, 0)),
                pl.BlockSpec((1, OUT_pad), lambda t: (0, 0)),
            ],
            out_specs=pl.BlockSpec((B_pad, OUT_pad), lambda t: (0, 0)),
            scratch_shapes=[
                pltpu.VMEM((B_pad, H_pad), f32),  # h state, persists across grid
                pltpu.VMEM((B_pad, H_pad), f32),  # c state
            ],
        ),
        compiler_params=pltpu.CompilerParams(
            # the recurrence is inherently sequential over time
            dimension_semantics=("arbitrary",),
        ),
    )(xw, whh_p, wlin_p, blin_p)

    # TODO(synk): for large B on v7x, add a leading "parallel" batch grid axis
    # to use the second TensorCore (irrelevant at B=2).
    return out_p[:B, :out_dim]


def lstm_forward_ref(x, w_ih, w_hh, b_ih, b_hh, w_lin, b_lin):
    """Pure-JAX f32 reference matching torch.nn.LSTM(batch_first=True) + Linear."""
    B, T, _ = x.shape
    H = w_hh.shape[1]
    h = jnp.zeros((B, H), jnp.float32)
    c = jnp.zeros((B, H), jnp.float32)
    for t in range(T):
        g = x[:, t, :] @ w_ih.T + h @ w_hh.T + b_ih + b_hh
        i = jax.nn.sigmoid(g[:, 0:H])
        f = jax.nn.sigmoid(g[:, H:2 * H])
        gg = jnp.tanh(g[:, 2 * H:3 * H])
        o = jax.nn.sigmoid(g[:, 3 * H:4 * H])
        c = f * c + i * gg
        h = o * jnp.tanh(c)
    return h @ w_lin.T + b_lin


if __name__ == "__main__":
    # small shapes consistent with the module's forward
    B, T, IN_DIM, HID_DIM, OUT_DIM = 2, 8, 4, 32, 8

    key = jax.random.PRNGKey(0)
    ks = jax.random.split(key, 8)
    bound = 1.0 / np.sqrt(HID_DIM)  # PyTorch default init bound

    x = jax.random.normal(ks[0], (B, T, IN_DIM), dtype=jnp.float32)
    w_ih = jax.random.uniform(ks[1], (4 * HID_DIM, IN_DIM), minval=-bound, maxval=bound)
    w_hh = jax.random.uniform(ks[2], (4 * HID_DIM, HID_DIM), minval=-bound, maxval=bound)
    b_ih = jax.random.uniform(ks[3], (4 * HID_DIM,), minval=-bound, maxval=bound)
    b_hh = jax.random.uniform(ks[4], (4 * HID_DIM,), minval=-bound, maxval=bound)
    w_lin = jax.random.uniform(ks[5], (OUT_DIM, HID_DIM), minval=-bound, maxval=bound)
    b_lin = jax.random.uniform(ks[6], (OUT_DIM,), minval=-bound, maxval=bound)

    out = lstm_forward(x, w_ih, w_hh, b_ih, b_hh, w_lin, b_lin)
    out = jax.block_until_ready(out)

    ref = lstm_forward_ref(x, w_ih, w_hh, b_ih, b_hh, w_lin, b_lin)
    # bf16 MXU operands for the h->h matmul -> loosened tolerance (expected
    # precision shift, not a bug).
    np.testing.assert_allclose(np.asarray(out), np.asarray(ref), rtol=1e-2, atol=1e-2)

    print("KERNEL_OK")
</pallas_src>

<mosaic_0001>
module attributes {stable_mosaic.version = 11 : i64} {
  func.func @lstm_kernel(%arg0: i32, %arg1: memref<4x8x512xf32, #tpu.memory_space<vmem>>, %arg2: memref<128x512xbf16, #tpu.memory_space<vmem>>, %arg3: memref<128x128xf32, #tpu.memory_space<vmem>>, %arg4: memref<1x128xf32, #tpu.memory_space<vmem>>, %arg5: memref<8x128xf32, #tpu.memory_space<vmem>>, %arg6: memref<8x128xf32, #tpu.memory_space<vmem>>, %arg7: memref<8x128xf32, #tpu.memory_space<vmem>>) attributes {dimension_semantics = [#tpu.dimension_semantics<arbitrary>], iteration_bounds = array<i64: 2>, scalar_prefetch = 0 : i64, scratch_operands = 2 : i64, tpu.core_type = #tpu.core_type<tc>, window_params = [{transform_indices = @transform_0, window_bounds = array<i64: 4, 8, 512>}, {pipeline_mode = #tpu.pipeline_mode<synchronous>, transform_indices = @transform_1, window_bounds = array<i64: 128, 512>}, {pipeline_mode = #tpu.pipeline_mode<synchronous>, transform_indices = @transform_2, window_bounds = array<i64: 128, 128>}, {pipeline_mode = #tpu.pipeline_mode<synchronous>, transform_indices = @transform_3, window_bounds = array<i64: 1, 128>}, {pipeline_mode = #tpu.pipeline_mode<synchronous>, transform_indices = @transform_4, window_bounds = array<i64: 8, 128>}]} {
    %c0_i32 = arith.constant 0 : i32
    %0 = arith.cmpi eq, %arg0, %c0_i32 : i32
    %1 = arith.extui %0 : i1 to i32
    %c0_i32_0 = arith.constant 0 : i32
    %2 = arith.cmpi ne, %1, %c0_i32_0 : i32
    scf.if %2 {
      %cst_41 = arith.constant 0.000000e+00 : f32
      %138 = vector.broadcast %cst_41 : f32 to vector<8x128xf32>
      %c0_42 = arith.constant 0 : index
      %c0_43 = arith.constant 0 : index
      %139 = vector.load %arg6[%c0_42, %c0_43] : memref<8x128xf32, #tpu.memory_space<vmem>>, vector<8x128xf32>
      tpu.vector_store %arg6[%c0_42, %c0_43], %138 {strides = array<i32>} : memref<8x128xf32, #tpu.memory_space<vmem>>, vector<8x128xf32>,
      %cst_44 = arith.constant 0.000000e+00 : f32
      %140 = vector.broadcast %cst_44 : f32 to vector<8x128xf32>
      %c0_45 = arith.constant 0 : index
      %c0_46 = arith.constant 0 : index
      %141 = vector.load %arg7[%c0_45, %c0_46] : memref<8x128xf32, #tpu.memory_space<vmem>>, vector<8x128xf32>
      tpu.vector_store %arg7[%c0_45, %c0_46], %140 {strides = array<i32>} : memref<8x128xf32, #tpu.memory_space<vmem>>, vector<8x128xf32>,
    } else {
    }
    %c0 = arith.constant 0 : index
    %c0_1 = arith.constant 0 : index
    %3 = vector.load %arg2[%c0, %c0_1] : memref<128x512xbf16, #tpu.memory_space<vmem>>, vector<128x512xbf16>
    %c0_2 = arith.constant 0 : index
    %c0_3 = arith.constant 0 : index
    %4 = vector.load %arg6[%c0_2, %c0_3] : memref<8x128xf32, #tpu.memory_space<vmem>>, vector<8x128xf32>
    %c0_4 = arith.constant 0 : index
    %c0_5 = arith.constant 0 : index
    %5 = vector.load %arg7[%c0_4, %c0_5] : memref<8x128xf32, #tpu.memory_space<vmem>>, vector<8x128xf32>
    %c0_i32_6 = arith.constant 0 : i32
    %6 = arith.index_cast %c0_i32_6 : i32 to index
    %c0_7 = arith.constant 0 : index
    %c0_8 = arith.constant 0 : index
    %7 = vector.load %arg1[%6, %c0_7, %c0_8] : memref<4x8x512xf32, #tpu.memory_space<vmem>>, vector<1x8x512xf32>
    %8 = vector.shape_cast %7 : vector<1x8x512xf32> to vector<8x512xf32>
    %9 = arith.truncf %4 : vector<8x128xf32> to vector<8x128xbf16>
    %cst = arith.constant dense<0.000000e+00> : vector<8x512xf32>
    %10 = tpu.matmul %9, %3, %cst {dimension_numbers = #tpu.dot_dimension_numbers<[1], [0], [0], [1], [0, 0, 1, 1], [], []>} : vector<8x128xbf16>, vector<128x512xbf16>, vector<8x512xf32> -> vector<8x512xf32>
    %11 = arith.addf %8, %10 : vector<8x512xf32>
    %12 = vector.extract_strided_slice %11 {offsets = [0, 0], sizes = [8, 128], strides = [1, 1]} : vector<8x512xf32> to vector<8x128xf32>
    %13 = arith.negf %12 : vector<8x128xf32>
    %14 = math.exp %13 : vector<8x128xf32>
    %cst_9 = arith.constant 1.000000e+00 : f32
    %15 = vector.broadcast %cst_9 : f32 to vector<8x128xf32>
    %16 = arith.addf %15, %14 : vector<8x128xf32>
    %17 = arith.divf %15, %16 : vector<8x128xf32>
    %18 = vector.extract_strided_slice %11 {offsets = [0, 128], sizes = [8, 128], strides = [1, 1]} : vector<8x512xf32> to vector<8x128xf32>
    %19 = arith.negf %18 : vector<8x128xf32>
    %20 = math.exp %19 : vector<8x128xf32>
    %cst_10 = arith.constant 1.000000e+00 : f32
    %21 = vector.broadcast %cst_10 : f32 to vector<8x128xf32>
    %22 = arith.addf %21, %20 : vector<8x128xf32>
    %23 = arith.divf %21, %22 : vector<8x128xf32>
    %24 = vector.extract_strided_slice %11 {offsets = [0, 256], sizes = [8, 128], strides = [1, 1]} : vector<8x512xf32> to vector<8x128xf32>
    %25 = math.tanh %24 : vector<8x128xf32>
    %26 = vector.extract_strided_slice %11 {offsets = [0, 384], sizes = [8, 128], strides = [1, 1]} : vector<8x512xf32> to vector<8x128xf32>
    %27 = arith.negf %26 : vector<8x128xf32>
    %28 = math.exp %27 : vector<8x128xf32>
    %cst_11 = arith.constant 1.000000e+00 : f32
    %29 = vector.broadcast %cst_11 : f32 to vector<8x128xf32>
    %30 = arith.addf %29, %28 : vector<8x128xf32>
    %31 = arith.divf %29, %30 : vector<8x128xf32>
    %32 = arith.mulf %23, %5 : vector<8x128xf32>
    %33 = arith.mulf %17, %25 : vector<8x128xf32>
    %34 = arith.addf %32, %33 : vector<8x128xf32>
    %35 = math.tanh %34 : vector<8x128xf32>
    %36 = arith.mulf %31, %35 : vector<8x128xf32>
    %c1_i32 = arith.constant 1 : i32
    %37 = arith.index_cast %c1_i32 : i32 to index
    %c0_12 = arith.constant 0 : index
    %c0_13 = arith.constant 0 : index
    %38 = vector.load %arg1[%37, %c0_12, %c0_13] : memref<4x8x512xf32, #tpu.memory_space<vmem>>, vector<1x8x512xf32>
    %39 = vector.shape_cast %38 : vector<1x8x512xf32> to vector<8x512xf32>
    %40 = arith.truncf %36 : vector<8x128xf32> to vector<8x128xbf16>
    %cst_14 = arith.constant dense<0.000000e+00> : vector<8x512xf32>
    %41 = tpu.matmul %40, %3, %cst_14 {dimension_numbers = #tpu.dot_dimension_numbers<[1], [0], [0], [1], [0, 0, 1, 1], [], []>} : vector<8x128xbf16>, vector<128x512xbf16>, vector<8x512xf32> -> vector<8x512xf32>
    %42 = arith.addf %39, %41 : vector<8x512xf32>
    %43 = vector.extract_strided_slice %42 {offsets = [0, 0], sizes = [8, 128], strides = [1, 1]} : vector<8x512xf32> to vector<8x128xf32>
    %44 = arith.negf %43 : vector<8x128xf32>
    %45 = math.exp %44 : vector<8x128xf32>
    %cst_15 = arith.constant 1.000000e+00 : f32
    %46 = vector.broadcast %cst_15 : f32 to vector<8x128xf32>
    %47 = arith.addf %46, %45 : vector<8x128xf32>
    %48 = arith.divf %46, %47 : vector<8x128xf32>
    %49 = vector.extract_strided_slice %42 {offsets = [0, 128], sizes = [8, 128], strides = [1, 1]} : vector<8x512xf32> to vector<8x128xf32>
    %50 = arith.negf %49 : vector<8x128xf32>
    %51 = math.exp %50 : vector<8x128xf32>
    %cst_16 = arith.constant 1.000000e+00 : f32
    %52 = vector.broadcast %cst_16 : f32 to vector<8x128xf32>
    %53 = arith.addf %52, %51 : vector<8x128xf32>
    %54 = arith.divf %52, %53 : vector<8x128xf32>
    %55 = vector.extract_strided_slice %42 {offsets = [0, 256], sizes = [8, 128], strides = [1, 1]} : vector<8x512xf32> to vector<8x128xf32>
    %56 = math.tanh %55 : vector<8x128xf32>
    %57 = vector.extract_strided_slice %42 {offsets = [0, 384], sizes = [8, 128], strides = [1, 1]} : vector<8x512xf32> to vector<8x128xf32>
    %58 = arith.negf %57 : vector<8x128xf32>
    %59 = math.exp %58 : vector<8x128xf32>
    %cst_17 = arith.constant 1.000000e+00 : f32
    %60 = vector.broadcast %cst_17 : f32 to vector<8x128xf32>
    %61 = arith.addf %60, %59 : vector<8x128xf32>
    %62 = arith.divf %60, %61 : vector<8x128xf32>
    %63 = arith.mulf %54, %34 : vector<8x128xf32>
    %64 = arith.mulf %48, %56 : vector<8x128xf32>
    %65 = arith.addf %63, %64 : vector<8x128xf32>
    %66 = math.tanh %65 : vector<8x128xf32>
    %67 = arith.mulf %62, %66 : vector<8x128xf32>
    %c2_i32 = arith.constant 2 : i32
    %68 = arith.index_cast %c2_i32 : i32 to index
    %c0_18 = arith.constant 0 : index
    %c0_19 = arith.constant 0 : index
    %69 = vector.load %arg1[%68, %c0_18, %c0_19] : memref<4x8x512xf32, #tpu.memory_space<vmem>>, vector<1x8x512xf32>
    %70 = vector.shape_cast %69 : vector<1x8x512xf32> to vector<8x512xf32>
    %71 = arith.truncf %67 : vector<8x128xf32> to vector<8x128xbf16>
    %cst_20 = arith.constant dense<0.000000e+00> : vector<8x512xf32>
    %72 = tpu.matmul %71, %3, %cst_20 {dimension_numbers = #tpu.dot_dimension_numbers<[1], [0], [0], [1], [0, 0, 1, 1], [], []>} : vector<8x128xbf16>, vector<128x512xbf16>, vector<8x512xf32> -> vector<8x512xf32>
    %73 = arith.addf %70, %72 : vector<8x512xf32>
    %74 = vector.extract_strided_slice %73 {offsets = [0, 0], sizes = [8, 128], strides = [1, 1]} : vector<8x512xf32> to vector<8x128xf32>
    %75 = arith.negf %74 : vector<8x128xf32>
    %76 = math.exp %75 : vector<8x128xf32>
    %cst_21 = arith.constant 1.000000e+00 : f32
    %77 = vector.broadcast %cst_21 : f32 to vector<8x128xf32>
    %78 = arith.addf %77, %76 : vector<8x128xf32>
    %79 = arith.divf %77, %78 : vector<8x128xf32>
    %80 = vector.extract_strided_slice %73 {offsets = [0, 128], sizes = [8, 128], strides = [1, 1]} : vector<8x512xf32> to vector<8x128xf32>
    %81 = arith.negf %80 : vector<8x128xf32>
    %82 = math.exp %81 : vector<8x128xf32>
    %cst_22 = arith.constant 1.000000e+00 : f32
    %83 = vector.broadcast %cst_22 : f32 to vector<8x128xf32>
    %84 = arith.addf %83, %82 : vector<8x128xf32>
    %85 = arith.divf %83, %84 : vector<8x128xf32>
    %86 = vector.extract_strided_slice %73 {offsets = [0, 256], sizes = [8, 128], strides = [1, 1]} : vector<8x512xf32> to vector<8x128xf32>
    %87 = math.tanh %86 : vector<8x128xf32>
    %88 = vector.extract_strided_slice %73 {offsets = [0, 384], sizes = [8, 128], strides = [1, 1]} : vector<8x512xf32> to vector<8x128xf32>
    %89 = arith.negf %88 : vector<8x128xf32>
    %90 = math.exp %89 : vector<8x128xf32>
    %cst_23 = arith.constant 1.000000e+00 : f32
    %91 = vector.broadcast %cst_23 : f32 to vector<8x128xf32>
    %92 = arith.addf %91, %90 : vector<8x128xf32>
    %93 = arith.divf %91, %92 : vector<8x128xf32>
    %94 = arith.mulf %85, %65 : vector<8x128xf32>
    %95 = arith.mulf %79, %87 : vector<8x128xf32>
    %96 = arith.addf %94, %95 : vector<8x128xf32>
    %97 = math.tanh %96 : vector<8x128xf32>
    %98 = arith.mulf %93, %97 : vector<8x128xf32>
    %c3_i32 = arith.constant 3 : i32
    %99 = arith.index_cast %c3_i32 : i32 to index
    %c0_24 = arith.constant 0 : index
    %c0_25 = arith.constant 0 : index
    %100 = vector.load %arg1[%99, %c0_24, %c0_25] : memref<4x8x512xf32, #tpu.memory_space<vmem>>, vector<1x8x512xf32>
    %101 = vector.shape_cast %100 : vector<1x8x512xf32> to vector<8x512xf32>
    %102 = arith.truncf %98 : vector<8x128xf32> to vector<8x128xbf16>
    %cst_26 = arith.constant dense<0.000000e+00> : vector<8x512xf32>
    %103 = tpu.matmul %102, %3, %cst_26 {dimension_numbers = #tpu.dot_dimension_numbers<[1], [0], [0], [1], [0, 0, 1, 1], [], []>} : vector<8x128xbf16>, vector<128x512xbf16>, vector<8x512xf32> -> vector<8x512xf32>
    %104 = arith.addf %101, %103 : vector<8x512xf32>
    %105 = vector.extract_strided_slice %104 {offsets = [0, 0], sizes = [8, 128], strides = [1, 1]} : vector<8x512xf32> to vector<8x128xf32>
    %106 = arith.negf %105 : vector<8x128xf32>
    %107 = math.exp %106 : vector<8x128xf32>
    %cst_27 = arith.constant 1.000000e+00 : f32
    %108 = vector.broadcast %cst_27 : f32 to vector<8x128xf32>
    %109 = arith.addf %108, %107 : vector<8x128xf32>
    %110 = arith.divf %108, %109 : vector<8x128xf32>
    %111 = vector.extract_strided_slice %104 {offsets = [0, 128], sizes = [8, 128], strides = [1, 1]} : vector<8x512xf32> to vector<8x128xf32>
    %112 = arith.negf %111 : vector<8x128xf32>
    %113 = math.exp %112 : vector<8x128xf32>
    %cst_28 = arith.constant 1.000000e+00 : f32
    %114 = vector.broadcast %cst_28 : f32 to vector<8x128xf32>
    %115 = arith.addf %114, %113 : vector<8x128xf32>
    %116 = arith.divf %114, %115 : vector<8x128xf32>
    %117 = vector.extract_strided_slice %104 {offsets = [0, 256], sizes = [8, 128], strides = [1, 1]} : vector<8x512xf32> to vector<8x128xf32>
    %118 = math.tanh %117 : vector<8x128xf32>
    %119 = vector.extract_strided_slice %104 {offsets = [0, 384], sizes = [8, 128], strides = [1, 1]} : vector<8x512xf32> to vector<8x128xf32>
    %120 = arith.negf %119 : vector<8x128xf32>
    %121 = math.exp %120 : vector<8x128xf32>
    %cst_29 = arith.constant 1.000000e+00 : f32
    %122 = vector.broadcast %cst_29 : f32 to vector<8x128xf32>
    %123 = arith.addf %122, %121 : vector<8x128xf32>
    %124 = arith.divf %122, %123 : vector<8x128xf32>
    %125 = arith.mulf %116, %96 : vector<8x128xf32>
    %126 = arith.mulf %110, %118 : vector<8x128xf32>
    %127 = arith.addf %125, %126 : vector<8x128xf32>
    %128 = math.tanh %127 : vector<8x128xf32>
    %129 = arith.mulf %124, %128 : vector<8x128xf32>
    %c4_i32 = arith.constant 4 : i32
    %c0_30 = arith.constant 0 : index
    %c0_31 = arith.constant 0 : index
    %130 = vector.load %arg6[%c0_30, %c0_31] : memref<8x128xf32, #tpu.memory_space<vmem>>, vector<8x128xf32>
    tpu.vector_store %arg6[%c0_30, %c0_31], %129 {strides = array<i32>} : memref<8x128xf32, #tpu.memory_space<vmem>>, vector<8x128xf32>,
    %c0_32 = arith.constant 0 : index
    %c0_33 = arith.constant 0 : index
    %131 = vector.load %arg7[%c0_32, %c0_33] : memref<8x128xf32, #tpu.memory_space<vmem>>, vector<8x128xf32>
    tpu.vector_store %arg7[%c0_32, %c0_33], %127 {strides = array<i32>} : memref<8x128xf32, #tpu.memory_space<vmem>>, vector<8x128xf32>,
    %c0_34 = arith.constant 0 : index
    %c0_35 = arith.constant 0 : index
    %132 = vector.load %arg3[%c0_34, %c0_35] : memref<128x128xf32, #tpu.memory_space<vmem>>, vector<128x128xf32>
    %cst_36 = arith.constant dense<0.000000e+00> : vector<8x128xf32>
    %133 = tpu.matmul %129, %132, %cst_36 {dimension_numbers = #tpu.dot_dimension_numbers<[1], [0], [0], [1], [0, 0, 1, 1], [], []>} : vector<8x128xf32>, vector<128x128xf32>, vector<8x128xf32> -> vector<8x128xf32>
    %c0_37 = arith.constant 0 : index
    %c0_38 = arith.constant 0 : index
    %134 = vector.load %arg4[%c0_37, %c0_38] : memref<1x128xf32, #tpu.memory_space<vmem>>, vector<1x128xf32>
    %135 = vector.broadcast %134 : vector<1x128xf32> to vector<8x128xf32>
    %136 = arith.addf %133, %135 : vector<8x128xf32>
    %c0_39 = arith.constant 0 : index
    %c0_40 = arith.constant 0 : index
    %137 = vector.load %arg5[%c0_39, %c0_40] : memref<8x128xf32, #tpu.memory_space<vmem>>, vector<8x128xf32>
    tpu.vector_store %arg5[%c0_39, %c0_40], %136 {strides = array<i32>} : memref<8x128xf32, #tpu.memory_space<vmem>>, vector<8x128xf32>,
    return
  }
  func.func @transform_0(%arg0: i32) -> (i32, i32, i32) {
    %c0_i32 = arith.constant 0 : i32
    %c0_i32_0 = arith.constant 0 : i32
    %c0_i32_1 = arith.constant 0 : i32
    return %arg0, %c0_i32, %c0_i32_0 : i32, i32, i32
  }
  func.func @transform_1(%arg0: i32) -> (i32, i32) {
    %c0_i32 = arith.constant 0 : i32
    %c0_i32_0 = arith.constant 0 : i32
    %c0_i32_1 = arith.constant 0 : i32
    return %c0_i32, %c0_i32_0 : i32, i32
  }
  func.func @transform_2(%arg0: i32) -> (i32, i32) {
    %c0_i32 = arith.constant 0 : i32
    %c0_i32_0 = arith.constant 0 : i32
    %c0_i32_1 = arith.constant 0 : i32
    return %c0_i32, %c0_i32_0 : i32, i32
  }
  func.func @transform_3(%arg0: i32) -> (i32, i32) {
    %c0_i32 = arith.constant 0 : i32
    %c0_i32_0 = arith.constant 0 : i32
    %c0_i32_1 = arith.constant 0 : i32
    return %c0_i32, %c0_i32_0 : i32, i32
  }
  func.func @transform_4(%arg0: i32) -> (i32, i32) {
    %c0_i32 = arith.constant 0 : i32
    %c0_i32_0 = arith.constant 0 : i32
    %c0_i32_1 = arith.constant 0 : i32
    return %c0_i32, %c0_i32_0 : i32, i32
  }
}

</mosaic_0001>

<bundles_post_ra>
// kernel: lstm_forward.1
= control target key start
LH: loop header
LB: loop body
LE: loop exit
PB: predicated region body
PF: predicated region fallthrough
CT: control target
= control target key end

     0   :  { %s1261_s15 = smov 0   ;;  %s1743_s0 = inlined_call_operand.vmem [shape: f32[8,8,512], index: 0, kind: input, shape index: {}]   ;;  %s1744_s1 = inlined_call_operand.vmem [shape: bf16[128,512], index: 1, kind: input, shape index: {}]   ;;  %s1745_s2 = inlined_call_operand.vmem [shape: f32[128,128], index: 2, kind: input, shape index: {}]   ;;  %s1746_s3 = inlined_call_operand.vmem [shape: f32[1,128], index: 3, kind: input, shape index: {}]   ;;  %s1747_s4 = inlined_call_operand.vmem [shape: f32[8,128], index: 4, kind: output, shape index: {}]  }
   0x1 LB: > { %s958_s16 = sadd.s32 4294967295, %s1233_s15   ;;  %p961_p0 = scmp.ge.s32.totalorder %s1233_s15, 1  ;;  %s1233_s15 = sphi %s1261_s15, %s14_s15  }
   0x2   : > { %p159_p1 = scmp.lt.s32.totalorder %s1233_s15, 3 }
   0x4   : > { %p160_p2 = pnand %p961_p0, %p159_p1 }
   0x5   : > { %s962_s17 = sshll.u32 (!%p160_p2), %s958_s16, 2  ;;  %p965_p4 = scmp.ne.s32.totalorder (!%p160_p2), %s958_s16, 0 }
   0x6   : > { %163 = sbr.rel (%p160_p2) target bundleno = 869 (0x365), region = 36  ;;  %p182_p3 = scmp.lt.s32.totalorder (!%p160_p2), %s962_s17, 7 }
   0xb   : > { %s1749_s17 = smov (!%p182_p3, %s962_s17), 7  ;;  %191 = sbr.rel (%p965_p4) target bundleno = 19 (0x13), region = 40 }
   0xc   : > { %s1120_s18 = sshll.u32 %s1749_s17, 5 }
   0xd   : > { %s1272_s21 = scalar_lea.vmem %s1743_s0, %s1120_s18 }
  0x10   : > { %v1235_v0 = vmov 0.0  }
  0x11   : > { %192 = vst [vmem:[#allocation2] sm:$0xff] %v1235_v0 }
  0x12   : > { %193 = vst [vmem:[#allocation3] sm:$0xff] %v1235_v0 }
  0x13 PF: > { %v1080_v1 = vld [vmem:[%s1744_s1 + $0xe0] sm:$0xf]  ;;  %v1151_v2 = vld [vmem:[%s1744_s1 + $0xec] sm:$0xf0]  ;;  %v1149_v3 = vld [vmem:[%s1744_s1 + $0xe4] sm:$0xf] }
  0x14   : > { %v1283_v4 = vor.u32 %v1151_v2, %v1080_v1  ;;  %v1082_v5 = vld [vmem:[%s1744_s1 + $0xf0] sm:$0xf0]  ;;  %v1150_v6 = vld [vmem:[%s1744_s1 + $0xec] sm:$0xf]  ;;  %v1090_v7 = vld [vmem:[%s1744_s1 + $0xf8] sm:$0xf0] }
  0x15   : > { %v1294_v8 = vor.u32 %v1149_v3, %v1082_v5  ;;  %v1296_v9 = vor.u32 %v1150_v6, %v1090_v7  ;;  %v1064_v10 = vld [vmem:[%s1744_s1 + $0xc0] sm:$0xf]  ;;  %v1147_v11 = vld [vmem:[%s1744_s1 + $0xcc] sm:$0xf0]  ;;  %v1145_v12 = vld [vmem:[%s1744_s1 + $0xc4] sm:$0xf] }
  0x16   : > { %393 = vmatpush.bf16.msra.mxu0 %v1283_v4  ;;  %v1308_v13 = vor.u32 %v1147_v11, %v1064_v10  ;;  %v1066_v14 = vld [vmem:[%s1744_s1 + $0xd0] sm:$0xf0]  ;;  %v1146_v15 = vld [vmem:[%s1744_s1 + $0xcc] sm:$0xf]  ;;  %v1074_v16 = vld [vmem:[%s1744_s1 + $0xd8] sm:$0xf0] }
  0x17   : > { %406 = vmatpush.bf16.msra.mxu1 %v1294_v8  ;;  %432 = vmatpush.bf16.msra.mxu3 %v1296_v9  ;;  %v1321_v17 = vor.u32 %v1145_v12, %v1066_v14  ;;  %v1323_v18 = vor.u32 %v1146_v15, %v1074_v16  ;;  %v1088_v19 = vld [vmem:[%s1744_s1 + $0xe8] sm:$0xf]  ;;  %v1152_v20 = vld [vmem:[%s1744_s1 + $0xf4] sm:$0xf0]  ;;  %v1048_v21 = vld [vmem:[%s1744_s1 + $0xa0] sm:$0xf] }
  0x18   : > { %v1334_v22 = vor.u32 %v1152_v20, %v1088_v19  ;;  %v1143_v23 = vld [vmem:[%s1744_s1 + $0xac] sm:$0xf0]  ;;  %v1141_v24 = vld [vmem:[%s1744_s1 + $0xa4] sm:$0xf]  ;;  %v1050_v25 = vld [vmem:[%s1744_s1 + $0xb0] sm:$0xf0] }
  0x19   : > { %v1142_v26 = vld [vmem:[%s1744_s1 + $0xac] sm:$0xf]  ;;  %v1058_v27 = vld [vmem:[%s1744_s1 + $0xb8] sm:$0xf0]  ;;  %v1072_v28 = vld [vmem:[%s1744_s1 + $0xc8] sm:$0xf]  ;;  %v1356_v29 = vor.u32 %v1143_v23, %v1048_v21  ;;  %v1369_v33 = vor.u32 %v1141_v24, %v1050_v25 }
  0x1a   : > { %394 = vmatpush.bf16.msra.mxu0 %v1308_v13  ;;  %419 = vmatpush.bf16.msra.mxu2 %v1334_v22  ;;  %v1148_v30 = vld [vmem:[%s1744_s1 + $0xd4] sm:$0xf0]  ;;  %v1032_v31 = vld [vmem:[%s1744_s1 + $0x80] sm:$0xf]  ;;  %v1139_v32 = vld [vmem:[%s1744_s1 + $0x8c] sm:$0xf0]  ;;  %v1371_v34 = vor.u32 %v1142_v26, %v1058_v27 }
  0x1b   : > { %407 = vmatpush.bf16.msra.mxu1 %v1321_v17  ;;  %433 = vmatpush.bf16.msra.mxu3 %v1323_v18  ;;  %v1373_v35 = vor.u32 %v1148_v30, %v1072_v28  ;;  %v1137_v36 = vld [vmem:[%s1744_s1 + $0x84] sm:$0xf]  ;;  %v1034_v37 = vld [vmem:[%s1744_s1 + $0x90] sm:$0xf0]  ;;  %v1138_v38 = vld [vmem:[%s1744_s1 + $0x8c] sm:$0xf]  ;;  %v1395_v42 = vor.u32 %v1139_v32, %v1032_v31 }
  0x1c   : > { %v1042_v39 = vld [vmem:[%s1744_s1 + $0x98] sm:$0xf0]  ;;  %v1056_v40 = vld [vmem:[%s1744_s1 + $0xa8] sm:$0xf]  ;;  %v1144_v41 = vld [vmem:[%s1744_s1 + $0xb4] sm:$0xf0]  ;;  %v1407_v46 = vor.u32 %v1137_v36, %v1034_v37 }
  0x1d   : > { %v1397_v43 = vor.u32 %v1144_v41, %v1056_v40  ;;  %v1016_v44 = vld [vmem:[%s1744_s1 + $0x60] sm:$0xf]  ;;  %v1135_v45 = vld [vmem:[%s1744_s1 + $0x6c] sm:$0xf0]  ;;  %v1409_v47 = vor.u32 %v1138_v38, %v1042_v39  ;;  %v1133_v48 = vld [vmem:[%s1744_s1 + $0x64] sm:$0xf] }
  0x1e   : > { %395 = vmatpush.bf16.msra.mxu0 %v1356_v29  ;;  %420 = vmatpush.bf16.msra.mxu2 %v1373_v35  ;;  %v1040_v49 = vld [vmem:[%s1744_s1 + $0x88] sm:$0xf]  ;;  %v1140_v50 = vld [vmem:[%s1744_s1 + $0x94] sm:$0xf0]  ;;  %v1018_v51 = vld [vmem:[%s1744_s1 + $0x70] sm:$0xf0]  ;;  %v1431_v54 = vor.u32 %v1135_v45, %v1016_v44 }
  0x1f   : > { %408 = vmatpush.bf16.msra.mxu1 %v1369_v33  ;;  %434 = vmatpush.bf16.msra.mxu3 %v1371_v34  ;;  %v1134_v52 = vld [vmem:[%s1744_s1 + $0x6c] sm:$0xf]  ;;  %v1026_v53 = vld [vmem:[%s1744_s1 + $0x78] sm:$0xf0]  ;;  %v1433_v55 = vor.u32 %v1140_v50, %v1040_v49  ;;  %v1000_v56 = vld [vmem:[%s1744_s1 + $0x40] sm:$0xf]  ;;  %v1443_v58 = vor.u32 %v1133_v48, %v1018_v51 }
  0x20   : > { %v1131_v57 = vld [vmem:[%s1744_s1 + $0x4c] sm:$0xf0]  ;;  %v1445_v59 = vor.u32 %v1134_v52, %v1026_v53  ;;  %v1129_v60 = vld [vmem:[%s1744_s1 + $0x44] sm:$0xf]  ;;  %v1024_v61 = vld [vmem:[%s1744_s1 + $0x68] sm:$0xf] }
  0x21   : > { %v1136_v62 = vld [vmem:[%s1744_s1 + $0x74] sm:$0xf0]  ;;  %v1002_v63 = vld [vmem:[%s1744_s1 + $0x50] sm:$0xf0]  ;;  %v1130_v0 = vld [vmem:[%s1744_s1 + $0x4c] sm:$0xf]  ;;  %v1467_v2 = vor.u32 %v1131_v57, %v1000_v56 }
  0x22   : > { %396 = vmatpush.bf16.msra.mxu0 %v1395_v42  ;;  %421 = vmatpush.bf16.msra.mxu2 %v1397_v43  ;;  %v1010_v1 = vld [vmem:[%s1744_s1 + $0x58] sm:$0xf0]  ;;  %v1469_v3 = vor.u32 %v1136_v62, %v1024_v61  ;;  %v984_v5 = vld [vmem:[%s1744_s1 + $0x20] sm:$0xf]  ;;  %v1127_v6 = vld [vmem:[%s1744_s1 + $0x2c] sm:$0xf0]  ;;  %v1479_v7 = vor.u32 %v1129_v60, %v1002_v63 }
  0x23   : > { %409 = vmatpush.bf16.msra.mxu1 %v1407_v46  ;;  %435 = vmatpush.bf16.msra.mxu3 %v1409_v47  ;;  %v1481_v10 = vor.u32 %v1130_v0, %v1010_v1  ;;  %v1125_v11 = vld [vmem:[%s1744_s1 + $0x24] sm:$0xf]  ;;  %v1008_v12 = vld [vmem:[%s1744_s1 + $0x48] sm:$0xf]  ;;  %v1132_v14 = vld [vmem:[%s1744_s1 + $0x54] sm:$0xf0]  ;;  %v1503_v20 = vor.u32 %v1127_v6, %v984_v5 }
  0x24   : > { %v986_v15 = vld [vmem:[%s1744_s1 + $0x30] sm:$0xf0]  ;;  %v1126_v16 = vld [vmem:[%s1744_s1 + $0x2c] sm:$0xf]  ;;  %v994_v19 = vld [vmem:[%s1744_s1 + $0x38] sm:$0xf0]  ;;  %v1505_v21 = vor.u32 %v1132_v14, %v1008_v12 }
  0x25   : > { %v968_v23 = vld [vmem:[%s1744_s1] sm:$0xf]  ;;  %v1123_v24 = vld [vmem:[%s1744_s1 + $0xc] sm:$0xf0]  ;;  %v1515_v25 = vor.u32 %v1125_v11, %v986_v15  ;;  %v1517_v26 = vor.u32 %v1126_v16, %v994_v19  ;;  %v1121_v27 = vld [vmem:[%s1744_s1 + $0x4] sm:$0xf] }
  0x26   : > { %397 = vmatpush.bf16.msra.mxu0 %v1431_v54  ;;  %422 = vmatpush.bf16.msra.mxu2 %v1433_v55  ;;  %v992_v28 = vld [vmem:[%s1744_s1 + $0x28] sm:$0xf]  ;;  %v1128_v30 = vld [vmem:[%s1744_s1 + $0x34] sm:$0xf0]  ;;  %v970_v31 = vld [vmem:[%s1744_s1 + $0x10] sm:$0xf0]  ;;  %v1539_v37 = vor.u32 %v1123_v24, %v968_v23 }
  0x27   : > { %410 = vmatpush.bf16.msra.mxu1 %v1443_v58  ;;  %436 = vmatpush.bf16.msra.mxu3 %v1445_v59  ;;  %v1122_v32 = vld [vmem:[%s1744_s1 + $0xc] sm:$0xf]  ;;  %v978_v36 = vld [vmem:[%s1744_s1 + $0x18] sm:$0xf0]  ;;  %v226_v38 = vld [vmem:[#allocation2] sm:$0xff]  ;;  %v1541_v39 = vor.u32 %v1128_v30, %v992_v28  ;;  %v1545_v40 = vor.u32 %v1121_v27, %v970_v31 }
  0x28   : > { %v1547_v41 = vor.u32 %v1122_v32, %v978_v36  ;;  %v976_v44 = vld [vmem:[%s1744_s1 + $0x8] sm:$0xf]  ;;  %v1124_v45 = vld [vmem:[%s1744_s1 + $0x14] sm:$0xf0]  ;;  %v232_v48 = vpack.c.bf16 %v226_v38, %v226_v38  ;;  %v228_v50 = vld [vmem:[%s1272_s21] sm:$0xff] }
  0x29   : > { %v1559_v49 = vor.u32 %v1124_v45, %v976_v44  ;;  %v229_v51 = vld [vmem:[%s1272_s21 + $0x8] sm:$0xff]  ;;  %v231_v62 = vld [vmem:[%s1272_s21 + $0x18] sm:$0xff]  ;;  %v230_v19 = vld [vmem:[%s1272_s21 + $0x10] sm:$0xff] }
  0x2a   : > { %398 = vmatpush.bf16.msra.mxu0 %v1467_v2  ;;  %423 = vmatpush.bf16.msra.mxu2 %v1469_v3 }
  0x2b   : > { %411 = vmatpush.bf16.msra.mxu1 %v1479_v7  ;;  %437 = vmatpush.bf16.msra.mxu3 %v1481_v10 }
  0x2e   : > { %399 = vmatpush.bf16.msra.mxu0 %v1503_v20  ;;  %424 = vmatpush.bf16.msra.mxu2 %v1505_v21 }
  0x2f   : > { %412 = vmatpush.bf16.msra.mxu1 %v1515_v25  ;;  %438 = vmatpush.bf16.msra.mxu3 %v1517_v26 }
  0x32   : > { %400 = vmatpush.bf16.msra.mxu0 %v1539_v37  ;;  %425 = vmatpush.bf16.msra.mxu2 %v1541_v39 }
  0x33   : > { %413 = vmatpush.bf16.msra.mxu1 %v1545_v40  ;;  %439 = vmatpush.bf16.msra.mxu3 %v1547_v41 }
  0x35   : > { %401 = vmatmul.bf16.vlgmr.msra.gmra.mxu0 %v232_v48 }
  0x36   : > { %518 = vmatpush.bf16.msrb.mxu0 %v1283_v4  ;;  %414 = vmatmul.bf16.vlgmr.msra.gmra.mxu1 %v232_v48 }
  0x37   : > { %531 = vmatpush.bf16.msrb.mxu1 %v1294_v8  ;;  %557 = vmatpush.bf16.msrb.mxu3 %v1296_v9 }
  0x38   : > { %440 = vmatmul.bf16.vlgmr.msra.gmra.mxu3 %v232_v48  ;;  %426 = vmatpush.bf16.msra.mxu2 %v1559_v49 }
  0x3a   : > { %519 = vmatpush.bf16.msrb.mxu0 %v1308_v13 }
  0x3b   : > { %532 = vmatpush.bf16.msrb.mxu1 %v1321_v17  ;;  %558 = vmatpush.bf16.msrb.mxu3 %v1323_v18 }
  0x3c   : > { %544 = vmatpush.bf16.msrb.mxu2 %v1334_v22 }
  0x3d   : > { %427 = vmatmul.bf16.vlgmr.msra.gmra.mxu2 %v232_v48 }
  0x3e   : > { %520 = vmatpush.bf16.msrb.mxu0 %v1356_v29 }
  0x3f   : > { %533 = vmatpush.bf16.msrb.mxu1 %v1369_v33  ;;  %559 = vmatpush.bf16.msrb.mxu3 %v1371_v34 }
  0x40   : > { %545 = vmatpush.bf16.msrb.mxu2 %v1373_v35 }
  0x42   : > { %521 = vmatpush.bf16.msrb.mxu0 %v1395_v42 }
  0x43   : > { %534 = vmatpush.bf16.msrb.mxu1 %v1407_v46  ;;  %560 = vmatpush.bf16.msrb.mxu3 %v1409_v47 }
  0x44   : > { %546 = vmatpush.bf16.msrb.mxu2 %v1397_v43 }
  0x46   : > { %522 = vmatpush.bf16.msrb.mxu0 %v1431_v54 }
  0x47   : > { %535 = vmatpush.bf16.msrb.mxu1 %v1443_v58  ;;  %561 = vmatpush.bf16.msrb.mxu3 %v1445_v59 }
  0x48   : > { %547 = vmatpush.bf16.msrb.mxu2 %v1433_v55 }
  0x4a   : > { %523 = vmatpush.bf16.msrb.mxu0 %v1467_v2 }
  0x4b   : > { %536 = vmatpush.bf16.msrb.mxu1 %v1479_v7  ;;  %562 = vmatpush.bf16.msrb.mxu3 %v1481_v10 }
  0x4c   : > { %548 = vmatpush.bf16.msrb.mxu2 %v1469_v3 }
  0x4e   : > { %524 = vmatpush.bf16.msrb.mxu0 %v1503_v20 }
  0x4f   : > { %537 = vmatpush.bf16.msrb.mxu1 %v1515_v25  ;;  %563 = vmatpush.bf16.msrb.mxu3 %v1517_v26 }
  0x50   : > { %549 = vmatpush.bf16.msrb.mxu2 %v1505_v21 }
  0x52   : > { %525 = vmatpush.bf16.msrb.mxu0 %v1539_v37 }
  0x53   : > { %538 = vmatpush.bf16.msrb.mxu1 %v1545_v40  ;;  %564 = vmatpush.bf16.msrb.mxu3 %v1547_v41 }
  0x54   : > { %550 = vmatpush.bf16.msrb.mxu2 %v1541_v39 }
  0x56   : > { %643 = vmatpush.bf16.msra.mxu0 %v1283_v4 }
  0x57   : > { %656 = vmatpush.bf16.msra.mxu1 %v1294_v8  ;;  %682 = vmatpush.bf16.msra.mxu3 %v1296_v9 }
  0x58   : > { %551 = vmatpush.bf16.msrb.mxu2 %v1559_v49 }
  0x5a   : > { %644 = vmatpush.bf16.msra.mxu0 %v1308_v13 }
  0x5b   : > { %657 = vmatpush.bf16.msra.mxu1 %v1321_v17  ;;  %683 = vmatpush.bf16.msra.mxu3 %v1323_v18 }
  0x5c   : > { %669 = vmatpush.bf16.msra.mxu2 %v1334_v22 }
  0x5e   : > { %645 = vmatpush.bf16.msra.mxu0 %v1356_v29 }
  0x5f   : > { %658 = vmatpush.bf16.msra.mxu1 %v1369_v33  ;;  %684 = vmatpush.bf16.msra.mxu3 %v1371_v34 }
  0x60   : > { %670 = vmatpush.bf16.msra.mxu2 %v1373_v35 }
  0x62   : > { %646 = vmatpush.bf16.msra.mxu0 %v1395_v42 }
  0x63   : > { %659 = vmatpush.bf16.msra.mxu1 %v1407_v46  ;;  %685 = vmatpush.bf16.msra.mxu3 %v1409_v47 }
  0x64   : > { %671 = vmatpush.bf16.msra.mxu2 %v1397_v43 }
  0x66   : > { %647 = vmatpush.bf16.msra.mxu0 %v1431_v54 }
  0x67   : > { %660 = vmatpush.bf16.msra.mxu1 %v1443_v58  ;;  %686 = vmatpush.bf16.msra.mxu3 %v1445_v59 }
  0x68   : > { %672 = vmatpush.bf16.msra.mxu2 %v1433_v55 }
  0x6a   : > { %648 = vmatpush.bf16.msra.mxu0 %v1467_v2 }
  0x6b   : > { %661 = vmatpush.bf16.msra.mxu1 %v1479_v7  ;;  %687 = vmatpush.bf16.msra.mxu3 %v1481_v10 }
  0x6c   : > { %673 = vmatpush.bf16.msra.mxu2 %v1469_v3 }
  0x6e   : > { %649 = vmatpush.bf16.msra.mxu0 %v1503_v20 }
  0x6f   : > { %662 = vmatpush.bf16.msra.mxu1 %v1515_v25  ;;  %688 = vmatpush.bf16.msra.mxu3 %v1517_v26 }
  0x70   : > { %674 = vmatpush.bf16.msra.mxu2 %v1505_v21 }
  0x72   : > { %650 = vmatpush.bf16.msra.mxu0 %v1539_v37 }
  0x73   : > { %663 = vmatpush.bf16.msra.mxu1 %v1545_v40  ;;  %689 = vmatpush.bf16.msra.mxu3 %v1547_v41 }
  0x74   : > { %675 = vmatpush.bf16.msra.mxu2 %v1541_v39 }
  0x78   : > { %676 = vmatpush.bf16.msra.mxu2 %v1559_v49 }
  0xb2   : > { %v402_v52 = vpop.f32.mrf.mxu0 }
  0xb3   : > { %v445_v53 = vadd.f32 %v402_v52, %v228_v50  ;;  %v415_v56 = vpop.f32.mrf.mxu1 }
  0xb4   : > { %v446_v57 = vadd.f32 %v415_v56, %v229_v51 }
  0xb5   : > { %v1094_v60 = vmul.f32 -1.442695, %v445_v53 }
  0xb6   : > { %v1095_v61 = vmul.f32 -1.442695, %v446_v57 }
  0xb7   : > { %1163 = vpow2.f32 %v1094_v60 }
  0xb8   : > { %1165 = vpow2.f32 %v1095_v61 }
  0xba   : > { %v404_v1 = vpop.f32.mrf.mxu0 }
  0xbb   : > { %v441_v63 = vpop.f32.mrf.mxu3  ;;  %v417_v5 = vpop.f32.mrf.mxu1 }
  0xbc   : > { %v448_v0 = vadd.f32 %v441_v63, %v231_v62  ;;  %v227_v5 = vld [vmem:[#allocation3] sm:$0xff] }
  0xbd   : > { %v1164_v11 = vpop.eup %1163 }
  0xbe   : > { %v1096_v6 = vmul.f32 -1.442695, %v448_v0  ;;  %v1166_v14 = vpop.eup %1165  ;;  %v452_v15 = vadd.f32 1.0, %v1164_v11 }
  0xbf   : > { %v471_v16 = vadd.f32 1.0, %v1166_v14 }
  0xc0   : > { %v428_v12 = vpop.f32.mrf.mxu2  ;;  %1167 = vpow2.f32 %v1096_v6  ;;  %v464_v48 = vand.u32 2147483648, %v452_v15  ;;  %v462_v52 = vand.u32 2147483647, %v452_v15  ;;  %vm458_vm2 = vweird.f32 %v452_v15 }
  0xc1   : > { %1169 = vrcp.f32 %v452_v15  ;;  %v447_v27 = vadd.f32 %v428_v12, %v230_v19  ;;  %v483_v50 = vand.u32 2147483648, %v471_v16  ;;  %v481_v56 = vand.u32 2147483647, %v471_v16 }
  0xc2   : > { %1171 = vrcp.f32 %v471_v16  ;;  %vm477_vm3 = vweird.f32 %v471_v16  ;;  %v465_v63 = vor.u32 1.1754944e-38, %v464_v48  ;;  %vm463_vm6 = vcmp.eq.f32.partialorder %v462_v52, 8.507059e+37 }
  0xc3   : > { %v443_v23 = vpop.f32.mrf.mxu3  ;;  %v484_v1 = vor.u32 1.1754944e-38, %v483_v50  ;;  %vm482_vm7 = vcmp.eq.f32.partialorder %v481_v56, 8.507059e+37 }
  0xc6   : > { %v1168_v24 = vpop.eup %1167 }
  0xc7   : > { %v491_v28 = vadd.f32 1.0, %v1168_v24  ;;  %v1170_v31 = vpop.eup %1169 }
  0xc8   : > { %v430_v30 = vpop.f32.mrf.mxu2  ;;  %v1172_v32 = vpop.eup %1171  ;;  %v454_v36 = vmul.f32 %v1170_v31, %v452_v15  ;;  %vm459_vm0 = vweird.f32 %v1170_v31 }
  0xc9   : > { %1173 = vrcp.f32 %v491_v28  ;;  %v473_v38 = vmul.f32 %v1172_v32, %v471_v16  ;;  %vm478_vm1 = vweird.f32 %v1172_v32  ;;  %vm460_vm4 = vmor %vm458_vm2, %vm459_vm0  ;;  %v503_v30 = vand.u32 2147483648, %v491_v28 }
  0xca   : > { %1175 = vtanh.f32 %v447_v27  ;;  %v455_v44 = vsub.f32 1.0, %v454_v36  ;;  %vm479_vm5 = vmor %vm477_vm3, %vm478_vm1  ;;  %vm497_vm9 = vweird.f32 %v491_v28  ;;  %v501_v36 = vand.u32 2147483647, %v491_v28 }
  0xcb   : > { %v474_v45 = vsub.f32 1.0, %v473_v38  ;;  %v504_v38 = vor.u32 1.1754944e-38, %v503_v30 }
  0xcc   : > { %v456_v51 = vmul.f32 %v1170_v31, %v455_v44  ;;  %vm502_vm11 = vcmp.eq.f32.partialorder %v501_v36, 8.507059e+37 }
  0xcd   : > { %v475_v53 = vmul.f32 %v1172_v32, %v474_v45 }
  0xce   : > { %v457_v60 = vadd.f32 %v1170_v31, %v456_v51 }
  0xcf   : > { %v1174_v57 = vpop.eup %1173  ;;  %v476_v0 = vadd.f32 %v1172_v32, %v475_v53 }
  0xd0   : > { %v1176_v61 = vpop.eup %1175  ;;  %v493_v62 = vmul.f32 %v1174_v57, %v491_v28  ;;  %v461_v6 = vsel %vm460_vm4, %v1170_v31, %v457_v60  ;;  %vm498_vm8 = vweird.f32 %v1174_v57 }
  0xd1   : > { %v466_v12 = vsel %vm463_vm6, %v465_v63, %v461_v6  ;;  %v480_v14 = vsel %vm479_vm5, %v1172_v32, %v476_v0  ;;  %vm499_vm10 = vmor %vm497_vm9, %vm498_vm8 }
  0xd2   : > { %v494_v11 = vsub.f32 1.0, %v493_v62  ;;  %v485_v19 = vsel %vm482_vm7, %v484_v1, %v480_v14  ;;  %v508_v23 = vmul.f32 %v1176_v61, %v466_v12 }
  0xd3   : > { %v507_v24 = vmul.f32 %v485_v19, %v227_v5 }
  0xd4   : > { %v495_v27 = vmul.f32 %v1174_v57, %v494_v11 }
  0xd5   : > { %v1630_v15 = vadd.f32 %v508_v23, %v507_v24 }
  0xd6   : > { %v496_v16 = vadd.f32 %v1174_v57, %v495_v27 }
  0xd7   : > { %1177 = vtanh.f32 %v1630_v15 }
  0xd8   : > { %v500_v31 = vsel %vm499_vm10, %v1174_v57, %v496_v16 }
  0xd9   : > { %v505_v32 = vsel %vm502_vm11, %v504_v38, %v500_v31 }
  0xdd   : > { %v1178_v44 = vpop.eup %1177 }
  0xde   : > { %v511_v45 = vmul.f32 %v1178_v44, %v505_v32 }
  0xe0   : > { %v517_v48 = vpack.c.bf16 %v511_v45, %v511_v45  ;;  %v1104_v45 = vld [vmem:[%s1272_s21 + $0x40] sm:$0xff] }
  0xe2   : > { %526 = vmatmul.bf16.vlgmr.msrb.gmra.mxu0 %v517_v48  ;;  %539 = vmatmul.bf16.vlgmr.msrb.gmra.mxu1 %v517_v48 }
  0xe3   : > { %552 = vmatmul.bf16.vlgmr.msrb.gmra.mxu2 %v517_v48  ;;  %565 = vmatmul.bf16.vlgmr.msrb.gmra.mxu3 %v517_v48  ;;  %v1105_v48 = vld [vmem:[%s1272_s21 + $0x48] sm:$0xff] }
  0xe4   : > { %768 = vmatpush.bf16.msrb.mxu0 %v1283_v4  ;;  %781 = vmatpush.bf16.msrb.mxu1 %v1294_v8  ;;  %v1097_v4 = vld [vmem:[%s1272_s21 + $0x20] sm:$0xff]  ;;  %v1098_v8 = vld [vmem:[%s1272_s21 + $0x28] sm:$0xff] }
  0xe5   : > { %794 = vmatpush.bf16.msrb.mxu2 %v1334_v22  ;;  %807 = vmatpush.bf16.msrb.mxu3 %v1296_v9 }
  0xe8   : > { %769 = vmatpush.bf16.msrb.mxu0 %v1308_v13  ;;  %782 = vmatpush.bf16.msrb.mxu1 %v1321_v17 }
  0xe9   : > { %795 = vmatpush.bf16.msrb.mxu2 %v1373_v35  ;;  %808 = vmatpush.bf16.msrb.mxu3 %v1323_v18 }
  0xec   : > { %770 = vmatpush.bf16.msrb.mxu0 %v1356_v29  ;;  %783 = vmatpush.bf16.msrb.mxu1 %v1369_v33  ;;  %v1100_v33 = vld [vmem:[%s1272_s21 + $0x38] sm:$0xff] }
  0xed   : > { %796 = vmatpush.bf16.msrb.mxu2 %v1397_v43  ;;  %809 = vmatpush.bf16.msrb.mxu3 %v1371_v34 }
  0xf0   : > { %771 = vmatpush.bf16.msrb.mxu0 %v1395_v42  ;;  %784 = vmatpush.bf16.msrb.mxu1 %v1407_v46 }
  0xf1   : > { %797 = vmatpush.bf16.msrb.mxu2 %v1433_v55  ;;  %810 = vmatpush.bf16.msrb.mxu3 %v1409_v47 }
  0xf4   : > { %772 = vmatpush.bf16.msrb.mxu0 %v1431_v54  ;;  %785 = vmatpush.bf16.msrb.mxu1 %v1443_v58 }
  0xf5   : > { %798 = vmatpush.bf16.msrb.mxu2 %v1469_v3  ;;  %811 = vmatpush.bf16.msrb.mxu3 %v1445_v59 }
  0xf8   : > { %773 = vmatpush.bf16.msrb.mxu0 %v1467_v2  ;;  %786 = vmatpush.bf16.msrb.mxu1 %v1479_v7  ;;  %v1099_v7 = vld [vmem:[%s1272_s21 + $0x30] sm:$0xff] }
  0xf9   : > { %799 = vmatpush.bf16.msrb.mxu2 %v1505_v21  ;;  %812 = vmatpush.bf16.msrb.mxu3 %v1481_v10 }
  0xfc   : > { %774 = vmatpush.bf16.msrb.mxu0 %v1503_v20  ;;  %787 = vmatpush.bf16.msrb.mxu1 %v1515_v25 }
  0xfd   : > { %800 = vmatpush.bf16.msrb.mxu2 %v1541_v39  ;;  %813 = vmatpush.bf16.msrb.mxu3 %v1517_v26 }
 0x100   : > { %775 = vmatpush.bf16.msrb.mxu0 %v1539_v37  ;;  %788 = vmatpush.bf16.msrb.mxu1 %v1545_v40 }
 0x101   : > { %801 = vmatpush.bf16.msrb.mxu2 %v1559_v49  ;;  %814 = vmatpush.bf16.msrb.mxu3 %v1547_v41 }
 0x15f   : > { %v527_v9 = vpop.f32.mrf.mxu0  ;;  %v540_v13 = vpop.f32.mrf.mxu1 }
 0x160   : > { %v570_v17 = vadd.f32 %v1097_v4, %v527_v9  ;;  %v571_v18 = vadd.f32 %v1098_v8, %v540_v13 }
 0x162   : > { %v1101_v22 = vmul.f32 -1.442695, %v570_v17  ;;  %v1102_v29 = vmul.f32 -1.442695, %v571_v18 }
 0x164   : > { %1179 = vpow2.f32 %v1101_v22  ;;  %v1107_v22 = vld [vmem:[%s1272_s21 + $0x58] sm:$0xff] }
 0x165   : > { %1181 = vpow2.f32 %v1102_v29 }
 0x166   : > { %v553_v34 = vpop.f32.mrf.mxu2  ;;  %v566_v35 = vpop.f32.mrf.mxu3 }
 0x167   : > { %v573_v42 = vadd.f32 %v1100_v33, %v566_v35  ;;  %v529_v43 = vpop.f32.mrf.mxu0  ;;  %v542_v46 = vpop.f32.mrf.mxu1  ;;  %v572_v25 = vadd.f32 %v1099_v7, %v553_v34 }
 0x169   : > { %v1103_v47 = vmul.f32 -1.442695, %v573_v42 }
 0x16a   : > { %v1180_v54 = vpop.eup %1179 }
 0x16b   : > { %v1182_v55 = vpop.eup %1181  ;;  %v577_v58 = vadd.f32 1.0, %v1180_v54  ;;  %1183 = vpow2.f32 %v1103_v47 }
 0x16c   : > { %v596_v59 = vadd.f32 1.0, %v1182_v55 }
 0x16d   : > { %1185 = vrcp.f32 %v577_v58  ;;  %v589_v49 = vand.u32 2147483648, %v577_v58  ;;  %v587_v51 = vand.u32 2147483647, %v577_v58  ;;  %vm583_vm14 = vweird.f32 %v577_v58 }
 0x16e   : > { %1187 = vrcp.f32 %v596_v59  ;;  %v555_v2 = vpop.f32.mrf.mxu2  ;;  %v568_v3 = vpop.f32.mrf.mxu3  ;;  %v608_v28 = vand.u32 2147483648, %v596_v59  ;;  %v606_v53 = vand.u32 2147483647, %v596_v59  ;;  %vm602_vm15 = vweird.f32 %v596_v59 }
 0x16f   : > { %v590_v60 = vor.u32 1.1754944e-38, %v589_v49  ;;  %vm588_vm2 = vcmp.eq.f32.partialorder %v587_v51, 8.507059e+37  ;;  %v1106_v2 = vld [vmem:[%s1272_s21 + $0x50] sm:$0xff] }
 0x170   : > { %v609_v63 = vor.u32 1.1754944e-38, %v608_v28  ;;  %vm607_vm3 = vcmp.eq.f32.partialorder %v606_v53, 8.507059e+37 }
 0x171   : > { %v1184_v10 = vpop.eup %1183 }
 0x172   : > { %v616_v20 = vadd.f32 1.0, %v1184_v10 }
 0x173   : > { %v1186_v21 = vpop.eup %1185 }
 0x174   : > { %v1188_v26 = vpop.eup %1187  ;;  %v579_v37 = vmul.f32 %v1186_v21, %v577_v58  ;;  %1189 = vrcp.f32 %v616_v20  ;;  %vm584_vm12 = vweird.f32 %v1186_v21  ;;  %v628_v16 = vand.u32 2147483648, %v616_v20 }
 0x175   : > { %v598_v39 = vmul.f32 %v1188_v26, %v596_v59  ;;  %1191 = vtanh.f32 %v572_v25  ;;  %vm603_vm13 = vweird.f32 %v1188_v26  ;;  %vm585_vm0 = vmor %vm583_vm14, %vm584_vm12  ;;  %vm622_vm5 = vweird.f32 %v616_v20 }
 0x176   : > { %v580_v40 = vsub.f32 1.0, %v579_v37  ;;  %vm604_vm1 = vmor %vm602_vm15, %vm603_vm13  ;;  %v626_v30 = vand.u32 2147483647, %v616_v20  ;;  %v629_v31 = vor.u32 1.1754944e-38, %v628_v16 }
 0x177   : > { %v599_v41 = vsub.f32 1.0, %v598_v39 }
 0x178   : > { %v581_v50 = vmul.f32 %v1186_v21, %v580_v40  ;;  %vm627_vm7 = vcmp.eq.f32.partialorder %v626_v30, 8.507059e+37 }
 0x179   : > { %v600_v52 = vmul.f32 %v1188_v26, %v599_v41 }
 0x17a   : > { %v1190_v56 = vpop.eup %1189  ;;  %v582_v57 = vadd.f32 %v1186_v21, %v581_v50 }
 0x17b   : > { %v601_v61 = vadd.f32 %v1188_v26, %v600_v52  ;;  %v618_v62 = vmul.f32 %v1190_v56, %v616_v20  ;;  %v1192_v1 = vpop.eup %1191  ;;  %vm623_vm4 = vweird.f32 %v1190_v56 }
 0x17c   : > { %v586_v0 = vsel %vm585_vm0, %v1186_v21, %v582_v57  ;;  %vm624_vm6 = vmor %vm622_vm5, %vm623_vm4 }
 0x17d   : > { %v591_v5 = vsel %vm588_vm2, %v590_v60, %v586_v0  ;;  %v605_v6 = vsel %vm604_vm1, %v1188_v26, %v601_v61  ;;  %v619_v11 = vsub.f32 1.0, %v618_v62 }
 0x17e   : > { %v610_v12 = vsel %vm607_vm3, %v609_v63, %v605_v6  ;;  %v633_v14 = vmul.f32 %v1192_v1, %v591_v5 }
 0x17f   : > { %v632_v19 = vmul.f32 %v610_v12, %v1630_v15  ;;  %v620_v23 = vmul.f32 %v1190_v56, %v619_v11 }
 0x181   : > { %v1670_v24 = vadd.f32 %v633_v14, %v632_v19  ;;  %v621_v27 = vadd.f32 %v1190_v56, %v620_v23 }
 0x183   : > { %1193 = vtanh.f32 %v1670_v24  ;;  %v625_v36 = vsel %vm624_vm6, %v1190_v56, %v621_v27 }
 0x184   : > { %v630_v44 = vsel %vm627_vm7, %v629_v31, %v625_v36 }
 0x189   : > { %v1194_v38 = vpop.eup %1193 }
 0x18a   : > { %v636_v15 = vmul.f32 %v1194_v38, %v630_v44 }
 0x18c   : > { %v642_v32 = vpack.c.bf16 %v636_v15, %v636_v15 }
 0x18e   : > { %651 = vmatmul.bf16.vlgmr.msra.gmra.mxu0 %v642_v32  ;;  %664 = vmatmul.bf16.vlgmr.msra.gmra.mxu1 %v642_v32 }
 0x18f   : > { %677 = vmatmul.bf16.vlgmr.msra.gmra.mxu2 %v642_v32  ;;  %690 = vmatmul.bf16.vlgmr.msra.gmra.mxu3 %v642_v32  ;;  %v903_v32 = vld [vmem:[%s1745_s2 + $0x70] sm:$0xff] }
 0x20b   : > { %v652_v4 = vpop.f32.mrf.mxu0  ;;  %v665_v8 = vpop.f32.mrf.mxu1 }
 0x20c   : > { %v695_v9 = vadd.f32 %v1104_v45, %v652_v4  ;;  %v696_v13 = vadd.f32 %v1105_v48, %v665_v8  ;;  %v902_v45 = vld [vmem:[%s1745_s2 + $0x68] sm:$0xff]  ;;  %v901_v48 = vld [vmem:[%s1745_s2 + $0x60] sm:$0xff]  ;;  %v900_v4 = vld [vmem:[%s1745_s2 + $0x58] sm:$0xff] }
 0x20d   : > { %v899_v8 = vld [vmem:[%s1745_s2 + $0x50] sm:$0xff] }
 0x20e   : > { %v1108_v17 = vmul.f32 -1.442695, %v695_v9  ;;  %v1109_v18 = vmul.f32 -1.442695, %v696_v13  ;;  %v898_v9 = vld [vmem:[%s1745_s2 + $0x48] sm:$0xff]  ;;  %v897_v13 = vld [vmem:[%s1745_s2 + $0x40] sm:$0xff] }
 0x210   : > { %1195 = vpow2.f32 %v1108_v17  ;;  %v896_v17 = vld [vmem:[%s1745_s2 + $0x38] sm:$0xff] }
 0x211   : > { %1197 = vpow2.f32 %v1109_v18  ;;  %v1111_v18 = vld [vmem:[%s1272_s21 + $0x60] sm:$0xff] }
 0x212   : > { %v678_v29 = vpop.f32.mrf.mxu2  ;;  %v691_v33 = vpop.f32.mrf.mxu3 }
 0x213   : > { %v698_v34 = vadd.f32 %v1107_v22, %v691_v33  ;;  %v654_v35 = vpop.f32.mrf.mxu0  ;;  %v667_v42 = vpop.f32.mrf.mxu1  ;;  %v697_v20 = vadd.f32 %v1106_v2, %v678_v29  ;;  %v1112_v22 = vld [vmem:[%s1272_s21 + $0x68] sm:$0xff]  ;;  %v895_v29 = vld [vmem:[%s1745_s2 + $0x30] sm:$0xff] }
 0x215   : > { %v1110_v43 = vmul.f32 -1.442695, %v698_v34 }
 0x216   : > { %v1196_v46 = vpop.eup %1195 }
 0x217   : > { %v1198_v47 = vpop.eup %1197  ;;  %v702_v54 = vadd.f32 1.0, %v1196_v46  ;;  %1199 = vpow2.f32 %v1110_v43  ;;  %v894_v43 = vld [vmem:[%s1745_s2 + $0x28] sm:$0xff] }
 0x218   : > { %v721_v55 = vadd.f32 1.0, %v1198_v47 }
 0x219   : > { %1201 = vrcp.f32 %v702_v54  ;;  %v714_v40 = vand.u32 2147483648, %v702_v54  ;;  %v712_v28 = vand.u32 2147483647, %v702_v54  ;;  %vm708_vm10 = vweird.f32 %v702_v54 }
 0x21a   : > { %1203 = vrcp.f32 %v721_v55  ;;  %v680_v58 = vpop.f32.mrf.mxu2  ;;  %v693_v59 = vpop.f32.mrf.mxu3  ;;  %v733_v41 = vand.u32 2147483648, %v721_v55  ;;  %v731_v51 = vand.u32 2147483647, %v721_v55  ;;  %vm727_vm11 = vweird.f32 %v721_v55 }
 0x21b   : > { %v715_v56 = vor.u32 1.1754944e-38, %v714_v40  ;;  %vm713_vm14 = vcmp.eq.f32.partialorder %v712_v28, 8.507059e+37  ;;  %v1114_v58 = vld [vmem:[%s1272_s21 + $0x78] sm:$0xff]  ;;  %v891_v59 = vld [vmem:[%s1745_s2 + $0x10] sm:$0xff] }
 0x21c   : > { %v734_v61 = vor.u32 1.1754944e-38, %v733_v41  ;;  %vm732_vm15 = vcmp.eq.f32.partialorder %v731_v51, 8.507059e+37 }
 0x21d   : > { %v1200_v3 = vpop.eup %1199 }
 0x21e   : > { %v741_v7 = vadd.f32 1.0, %v1200_v3 }
 0x21f   : > { %v1202_v10 = vpop.eup %1201 }
 0x220   : > { %v1204_v21 = vpop.eup %1203  ;;  %v704_v25 = vmul.f32 %v1202_v10, %v702_v54  ;;  %1205 = vrcp.f32 %v741_v7  ;;  %vm709_vm8 = vweird.f32 %v1202_v10  ;;  %v753_v27 = vand.u32 2147483648, %v741_v7  ;;  %v893_v54 = vld [vmem:[%s1745_s2 + $0x20] sm:$0xff] }
 0x221   : > { %v723_v26 = vmul.f32 %v1204_v21, %v721_v55  ;;  %1207 = vtanh.f32 %v697_v20  ;;  %vm728_vm9 = vweird.f32 %v1204_v21  ;;  %vm710_vm12 = vmor %vm708_vm10, %vm709_vm8  ;;  %vm747_vm1 = vweird.f32 %v741_v7  ;;  %v892_v55 = vld [vmem:[%s1745_s2 + $0x18] sm:$0xff] }
 0x222   : > { %v705_v37 = vsub.f32 1.0, %v704_v25  ;;  %vm729_vm13 = vmor %vm727_vm11, %vm728_vm9  ;;  %v751_v16 = vand.u32 2147483647, %v741_v7  ;;  %v754_v36 = vor.u32 1.1754944e-38, %v753_v27  ;;  %v889_v25 = vld [vmem:[%s1745_s2] sm:$0xff] }
 0x223   : > { %v724_v39 = vsub.f32 1.0, %v723_v26 }
 0x224   : > { %v706_v49 = vmul.f32 %v1202_v10, %v705_v37  ;;  %vm752_vm3 = vcmp.eq.f32.partialorder %v751_v16, 8.507059e+37 }
 0x225   : > { %v725_v50 = vmul.f32 %v1204_v21, %v724_v39 }
 0x226   : > { %v1206_v52 = vpop.eup %1205  ;;  %v707_v53 = vadd.f32 %v1202_v10, %v706_v49 }
 0x227   : > { %v726_v57 = vadd.f32 %v1204_v21, %v725_v50  ;;  %v743_v60 = vmul.f32 %v1206_v52, %v741_v7  ;;  %v1208_v63 = vpop.eup %1207  ;;  %vm748_vm0 = vweird.f32 %v1206_v52  ;;  %v890_v7 = vld [vmem:[%s1745_s2 + $0x8] sm:$0xff]  ;;  %v1113_v50 = vld [vmem:[%s1272_s21 + $0x70] sm:$0xff] }
 0x228   : > { %v711_v62 = vsel %vm710_vm12, %v1202_v10, %v707_v53  ;;  %vm749_vm2 = vmor %vm747_vm1, %vm748_vm0 }
 0x229   : > { %v716_v0 = vsel %vm713_vm14, %v715_v56, %v711_v62  ;;  %v730_v1 = vsel %vm729_vm13, %v1204_v21, %v726_v57  ;;  %v744_v5 = vsub.f32 1.0, %v743_v60 }
 0x22a   : > { %v735_v6 = vsel %vm732_vm15, %v734_v61, %v730_v1  ;;  %v758_v11 = vmul.f32 %v1208_v63, %v716_v0 }
 0x22b   : > { %v757_v12 = vmul.f32 %v735_v6, %v1670_v24  ;;  %v745_v14 = vmul.f32 %v1206_v52, %v744_v5  ;;  %v904_v24 = vld [vmem:[%s1745_s2 + $0x78] sm:$0xff] }
 0x22c   : > { %909 = vmatpush.msra.mxu0 %v904_v24 }
 0x22d   : > { %v1678_v19 = vadd.f32 %v758_v11, %v757_v12  ;;  %v746_v23 = vadd.f32 %v1206_v52, %v745_v14 }
 0x22e   : > { %910 = vmatpush.msra.mxu0 %v903_v32 }
 0x22f   : > { %1209 = vtanh.f32 %v1678_v19  ;;  %v750_v30 = vsel %vm749_vm2, %v1206_v52, %v746_v23 }
 0x230   : > { %v755_v38 = vsel %vm752_vm3, %v754_v36, %v750_v30  ;;  %911 = vmatpush.msra.mxu0 %v902_v45 }
 0x232   : > { %912 = vmatpush.msra.mxu0 %v901_v48 }
 0x234   : > { %913 = vmatpush.msra.mxu0 %v900_v4 }
 0x235   : > { %v1210_v31 = vpop.eup %1209 }
 0x236   : > { %v761_v44 = vmul.f32 %v1210_v31, %v755_v38  ;;  %914 = vmatpush.msra.mxu0 %v899_v8 }
 0x238   : > { %v767_v15 = vpack.c.bf16 %v761_v44, %v761_v44  ;;  %915 = vmatpush.msra.mxu0 %v898_v9 }
 0x23a   : > { %776 = vmatmul.bf16.vlgmr.msrb.gmra.mxu0 %v767_v15  ;;  %789 = vmatmul.bf16.vlgmr.msrb.gmra.mxu1 %v767_v15 }
 0x23b   : > { %802 = vmatmul.bf16.vlgmr.msrb.gmra.mxu2 %v767_v15  ;;  %815 = vmatmul.bf16.vlgmr.msrb.gmra.mxu3 %v767_v15 }
 0x23c   : > { %916 = vmatpush.msra.mxu0 %v897_v13 }
 0x23e   : > { %917 = vmatpush.msra.mxu0 %v896_v17 }
 0x240   : > { %918 = vmatpush.msra.mxu0 %v895_v29 }
 0x242   : > { %919 = vmatpush.msra.mxu0 %v894_v43 }
 0x244   : > { %920 = vmatpush.msra.mxu0 %v893_v54 }
 0x246   : > { %921 = vmatpush.msra.mxu0 %v892_v55 }
 0x248   : > { %922 = vmatpush.msra.mxu0 %v891_v59 }
 0x24a   : > { %923 = vmatpush.msra.mxu0 %v890_v7 }
 0x24c   : > { %924 = vmatpush.msra.mxu0 %v889_v25 }
 0x2b7   : > { %v777_v33 = vpop.f32.mrf.mxu0  ;;  %v790_v34 = vpop.f32.mrf.mxu1 }
 0x2b8   : > { %v820_v35 = vadd.f32 %v1111_v18, %v777_v33  ;;  %v821_v42 = vadd.f32 %v1112_v22, %v790_v34 }
 0x2ba   : > { %v1115_v46 = vmul.f32 -1.442695, %v820_v35  ;;  %v1116_v47 = vmul.f32 -1.442695, %v821_v42 }
 0x2bc   : > { %1211 = vpow2.f32 %v1115_v46 }
 0x2bd   : > { %1213 = vpow2.f32 %v1116_v47 }
 0x2be   : > { %v803_v2 = vpop.f32.mrf.mxu2  ;;  %v816_v3 = vpop.f32.mrf.mxu3 }
 0x2bf   : > { %v823_v10 = vadd.f32 %v1114_v58, %v816_v3  ;;  %v779_v20 = vpop.f32.mrf.mxu0  ;;  %v792_v21 = vpop.f32.mrf.mxu1  ;;  %v822_v56 = vadd.f32 %v1113_v50, %v803_v2 }
 0x2c1   : > { %v1117_v26 = vmul.f32 -1.442695, %v823_v10 }
 0x2c2   : > { %v1212_v37 = vpop.eup %1211 }
 0x2c3   : > { %v1214_v39 = vpop.eup %1213  ;;  %v827_v40 = vadd.f32 1.0, %v1212_v37  ;;  %1215 = vpow2.f32 %v1117_v26 }
 0x2c4   : > { %v846_v41 = vadd.f32 1.0, %v1214_v39 }
 0x2c5   : > { %1217 = vrcp.f32 %v827_v40  ;;  %v839_v0 = vand.u32 2147483648, %v827_v40  ;;  %v837_v6 = vand.u32 2147483647, %v827_v40  ;;  %vm833_vm6 = vweird.f32 %v827_v40 }
 0x2c6   : > { %1219 = vrcp.f32 %v846_v41  ;;  %v805_v49 = vpop.f32.mrf.mxu2  ;;  %v818_v28 = vpop.f32.mrf.mxu3  ;;  %v858_v1 = vand.u32 2147483648, %v846_v41  ;;  %v856_v12 = vand.u32 2147483647, %v846_v41  ;;  %vm852_vm7 = vweird.f32 %v846_v41 }
 0x2c7   : > { %v840_v27 = vor.u32 1.1754944e-38, %v839_v0  ;;  %vm838_vm10 = vcmp.eq.f32.partialorder %v837_v6, 8.507059e+37 }
 0x2c8   : > { %v859_v36 = vor.u32 1.1754944e-38, %v858_v1  ;;  %vm857_vm11 = vcmp.eq.f32.partialorder %v856_v12, 8.507059e+37 }
 0x2c9   : > { %v1216_v51 = vpop.eup %1215 }
 0x2ca   : > { %v866_v52 = vadd.f32 1.0, %v1216_v51 }
 0x2cb   : > { %v1218_v53 = vpop.eup %1217 }
 0x2cc   : > { %v1220_v57 = vpop.eup %1219  ;;  %v829_v60 = vmul.f32 %v1218_v53, %v827_v40  ;;  %1221 = vrcp.f32 %v866_v52  ;;  %vm834_vm4 = vweird.f32 %v1218_v53  ;;  %v878_v13 = vand.u32 2147483648, %v866_v52 }
 0x2cd   : > { %v848_v61 = vmul.f32 %v1220_v57, %v846_v41  ;;  %1223 = vtanh.f32 %v822_v56  ;;  %vm853_vm5 = vweird.f32 %v1220_v57  ;;  %vm835_vm8 = vmor %vm833_vm6, %vm834_vm4  ;;  %vm872_vm13 = vweird.f32 %v866_v52 }
 0x2ce   : > { %v830_v62 = vsub.f32 1.0, %v829_v60  ;;  %vm854_vm9 = vmor %vm852_vm7, %vm853_vm5  ;;  %v876_v17 = vand.u32 2147483647, %v866_v52  ;;  %v879_v22 = vor.u32 1.1754944e-38, %v878_v13 }
 0x2cf   : > { %v849_v63 = vsub.f32 1.0, %v848_v61 }
 0x2d0   : > { %v831_v5 = vmul.f32 %v1218_v53, %v830_v62  ;;  %vm877_vm15 = vcmp.eq.f32.partialorder %v876_v17, 8.507059e+37 }
 0x2d1   : > { %v850_v11 = vmul.f32 %v1220_v57, %v849_v63 }
 0x2d2   : > { %v1222_v14 = vpop.eup %1221  ;;  %v832_v23 = vadd.f32 %v1218_v53, %v831_v5 }
 0x2d3   : > { %v851_v16 = vadd.f32 %v1220_v57, %v850_v11  ;;  %v868_v30 = vmul.f32 %v1222_v14, %v866_v52  ;;  %v1224_v38 = vpop.eup %1223  ;;  %vm873_vm12 = vweird.f32 %v1222_v14 }
 0x2d4   : > { %v836_v31 = vsel %vm835_vm8, %v1218_v53, %v832_v23  ;;  %vm874_vm14 = vmor %vm872_vm13, %vm873_vm12 }
 0x2d5   : > { %v841_v44 = vsel %vm838_vm10, %v840_v27, %v836_v31  ;;  %v855_v15 = vsel %vm854_vm9, %v1220_v57, %v851_v16  ;;  %v869_v24 = vsub.f32 1.0, %v868_v30 }
 0x2d6   : > { %v860_v32 = vsel %vm857_vm11, %v859_v36, %v855_v15  ;;  %v883_v45 = vmul.f32 %v1224_v38, %v841_v44 }
 0x2d7   : > { %v882_v48 = vmul.f32 %v860_v32, %v1678_v19  ;;  %v870_v4 = vmul.f32 %v1222_v14, %v869_v24  ;;  %v1162_v19 = vld [vmem:[%s1746_s3] ss:$0 sm:$0xff] }
 0x2d9   : > { %v884_v8 = vadd.f32 %v883_v45, %v882_v48  ;;  %v871_v9 = vadd.f32 %v1222_v14, %v870_v4 }
 0x2db   : > { %1225 = vtanh.f32 %v884_v8  ;;  %888 = vst [vmem:[#allocation3] sm:$0xff] %v884_v8  ;;  %v875_v18 = vsel %vm874_vm14, %v1222_v14, %v871_v9 }
 0x2dc   : > { %v880_v33 = vsel %vm877_vm15, %v879_v22, %v875_v18 }
 0x2e1   : > { %v1226_v29 = vpop.eup %1225 }
 0x2e2   : > { %v886_v34 = vmul.f32 %v1226_v29, %v880_v33 }
 0x2e4   : > { %887 = vst [vmem:[#allocation2] sm:$0xff] %v886_v34  ;;  %925 = vmatmul.f32.vlgmr.msra.gmra.mxu0 %v886_v34 }
 0x361   : > { %v926_v35 = vpop.f32.mrf.mxu0 }
 0x362   : > { %v927_v42 = vadd.f32 %v1162_v19, %v926_v35 }
 0x364   : > { %929 = vst [vmem:[%s1747_s4] sm:$0xff] %v927_v42 }
 0x365 PF: > { %s14_s15 = sadd.s32 1, %s1233_s15  }
 0x366   : > { %p11_p5 = scmp.ge.s32.totalorder %s14_s15, 4  }
 0x368   :  { %13 = sbr.rel (!%p11_p5) target bundleno = 1 (0x1), region = 69 }

</bundles_post_ra>
